<compile_context>
chip_gen: v7x
topology: tpu7x:2x2x1
jax: 0.10.0
libtpu: 0.0.40
codegen_flags: <defaults>
</compile_context>

<pallas_src>
import functools

import jax
import jax.numpy as jnp
from jax import lax
from jax.experimental import pallas as pl
from jax.experimental.pallas import tpu as pltpu


def _round_up(x, m):
    return (x + m - 1) // m * m


def _qkv_projection_kernel(x_ref, w_ref, qkv_ref):
    # x_ref:   [tq, d_in]    sequence-row tile
    # w_ref:   [d_in, 3*Dp]  fused [Wq*scale | Wk | Wv], zero-padded to Dp lanes
    # qkv_ref: [tq, 3*Dp]
    qkv_ref[...] = jnp.dot(
        x_ref[...], w_ref[...], preferred_element_type=jnp.float32
    ).astype(qkv_ref.dtype)


def _flash_attention_kernel(
    q_ref, k_ref, v_ref, o_ref, m_sc, l_sc, acc_sc, *, t_actual, t_padded, block_k
):
    # q_ref: [tq, Dp]  (scale already folded into the query projection)
    # k_ref: [tk, Dp], v_ref: [tk, Dp]
    # o_ref: [tq, Dp]
    ki = pl.program_id(1)

    @pl.when(ki == 0)
    def _init():
        m_sc[...] = jnp.full_like(m_sc, -jnp.inf)
        l_sc[...] = jnp.zeros_like(l_sc)
        acc_sc[...] = jnp.zeros_like(acc_sc)

    q = q_ref[...]
    k = k_ref[...]

    # scores[i, j] = q[i, :] . k[j, :] — contract last dims (no K transpose).
    s = lax.dot_general(
        q, k, (((1,), (1,)), ((), ())), preferred_element_type=jnp.float32
    )  # [tq, tk] f32

    # Mask zero-padded key rows (static no-op when the sequence isn't padded).
    if t_padded != t_actual:
        key_ids = ki * block_k + lax.broadcasted_iota(jnp.int32, s.shape, 1)
        s = jnp.where(key_ids < t_actual, s, jnp.float32(-1e30))

    # Online softmax update (f32 on the VPU/EUP).
    m_prev = m_sc[...]
    m_new = jnp.maximum(m_prev, jnp.max(s, axis=-1, keepdims=True))
    alpha = jnp.exp(m_prev - m_new)
    p = jnp.exp(s - m_new)  # [tq, tk] unnormalized probabilities

    l_sc[...] = alpha * l_sc[...] + jnp.sum(p, axis=-1, keepdims=True)
    acc_sc[...] = alpha * acc_sc[...] + jnp.dot(
        p.astype(v_ref.dtype), v_ref[...], preferred_element_type=jnp.float32
    )
    m_sc[...] = m_new

    @pl.when(ki == pl.num_programs(1) - 1)
    def _finalize():
        # Deferred softmax normalization on the small [tq, Dp] tile.
        o_ref[...] = (acc_sc[...] / l_sc[...]).astype(o_ref.dtype)


def self_attention_v2(x, w_query, w_key, w_value):
    """x: [T, d_in]; w_*: PyTorch Linear weights of shape [d_out, d_in] (no bias)."""
    T, d_in = x.shape
    d_out = w_query.shape[0]

    # Lane-dense feature dim: pad d_out up to a multiple of 128.
    d_pad = _round_up(max(d_out, 128), 128)
    scale = 1.0 / float(d_out) ** 0.5

    def _prep(w, s=1.0):  # [d_out, d_in] -> [d_in, d_pad], transposed + padded
        wt = w.T.astype(jnp.float32) * jnp.float32(s)
        return jnp.pad(wt, ((0, 0), (0, d_pad - d_out)))

    # Fused QKV weight (scale folded into the Q slab), fed at the input dtype.
    w_qkv = jnp.concatenate(
        [_prep(w_query, scale), _prep(w_key), _prep(w_value)], axis=1
    ).astype(x.dtype)  # [d_in, 3*d_pad]

    # Tile plan: 256x512 (tq x tk) flash tiles for long sequences; small
    # sequences collapse to a single sublane-aligned tile.
    if T >= 512:
        tq, tk = 256, 512
    elif T >= 256:
        tq, tk = 256, 256
    else:
        tq = tk = _round_up(T, 8)
    t_pad = _round_up(T, max(tq, tk))
    x_p = jnp.pad(x, ((0, t_pad - T), (0, 0))) if t_pad != T else x

    # --- Kernel 1: QKV projection, one pass over the sequence ----------------
    qkv = pl.pallas_call(
        _qkv_projection_kernel,
        out_shape=jax.ShapeDtypeStruct((t_pad, 3 * d_pad), x.dtype),
        grid=(t_pad // tq,),
        in_specs=[
            pl.BlockSpec((tq, d_in), lambda i: (i, 0)),
            pl.BlockSpec((d_in, 3 * d_pad), lambda i: (0, 0)),
        ],
        out_specs=pl.BlockSpec((tq, 3 * d_pad), lambda i: (i, 0)),
        compiler_params=pltpu.CompilerParams(dimension_semantics=("parallel",)),
    )(x_p, w_qkv)

    # --- Kernel 2: flash attention over (query tiles, kv tiles) --------------
    # The Q/K/V slabs are selected out of the fused qkv buffer purely via the
    # column block index of each BlockSpec (no XLA slicing copies).
    kernel = functools.partial(
        _flash_attention_kernel, t_actual=T, t_padded=t_pad, block_k=tk
    )
    out = pl.pallas_call(
        kernel,
        out_shape=jax.ShapeDtypeStruct((t_pad, d_pad), x.dtype),
        grid=(t_pad // tq, t_pad // tk),
        in_specs=[
            pl.BlockSpec((tq, d_pad), lambda qi, ki: (qi, 0)),  # Q tile
            pl.BlockSpec((tk, d_pad), lambda qi, ki: (ki, 1)),  # K tile
            pl.BlockSpec((tk, d_pad), lambda qi, ki: (ki, 2)),  # V tile
        ],
        out_specs=pl.BlockSpec((tq, d_pad), lambda qi, ki: (qi, 0)),
        scratch_shapes=[
            pltpu.VMEM((tq, 1), jnp.float32),      # running max m
            pltpu.VMEM((tq, 1), jnp.float32),      # running denom l
            pltpu.VMEM((tq, d_pad), jnp.float32),  # unnormalized context acc
        ],
        compiler_params=pltpu.CompilerParams(
            dimension_semantics=("parallel", "arbitrary"),
        ),
    )(qkv, qkv, qkv)

    return out[:T, :d_out]


def _reference(x, w_query, w_key, w_value):
    q = x @ w_query.T
    k = x @ w_key.T
    v = x @ w_value.T
    scores = q @ k.T / jnp.sqrt(jnp.float32(k.shape[-1]))
    w = jax.nn.softmax(scores, axis=-1)
    return w @ v


if __name__ == "__main__":
    key = jax.random.PRNGKey(0)
    T, d_in, d_out = 8, 32, 32  # small shapes consistent with the module

    k_x, k_x2, k_q, k_k, k_v = jax.random.split(key, 5)
    x = jax.random.normal(k_x, (T, d_in), dtype=jnp.float32)

    # Deterministic PyTorch-Linear-style init, qkv_bias=False (no biases).
    bound = 1.0 / (d_in ** 0.5)
    w_query = jax.random.uniform(k_q, (d_out, d_in), jnp.float32, -bound, bound)
    w_key = jax.random.uniform(k_k, (d_out, d_in), jnp.float32, -bound, bound)
    w_value = jax.random.uniform(k_v, (d_out, d_in), jnp.float32, -bound, bound)

    out = jax.block_until_ready(self_attention_v2(x, w_query, w_key, w_value))
    ref = _reference(x, w_query, w_key, w_value)
    assert out.shape == (T, d_out)
    assert jnp.allclose(out, ref, atol=1e-3, rtol=1e-3), "mismatch vs reference"

    # Second tiny case exercising the in-kernel key/query padding + mask path
    # (T=12 pads to 16 rows inside the kernel).
    T2 = 12
    x2 = jax.random.normal(k_x2, (T2, d_in), dtype=jnp.float32)
    out2 = jax.block_until_ready(self_attention_v2(x2, w_query, w_key, w_value))
    ref2 = _reference(x2, w_query, w_key, w_value)
    assert out2.shape == (T2, d_out)
    assert jnp.allclose(out2, ref2, atol=1e-3, rtol=1e-3), "mismatch (padded seq)"

    print("KERNEL_OK")
</pallas_src>

<mosaic_0001>
module attributes {stable_mosaic.version = 11 : i64} {
  func.func @_qkv_projection_kernel(%arg0: i32, %arg1: memref<8x32xf32, #tpu.memory_space<vmem>>, %arg2: memref<32x384xf32, #tpu.memory_space<vmem>>, %arg3: memref<8x384xf32, #tpu.memory_space<vmem>>) attributes {dimension_semantics = [#tpu.dimension_semantics<parallel>], iteration_bounds = array<i64: 1>, scalar_prefetch = 0 : i64, scratch_operands = 0 : i64, tpu.core_type = #tpu.core_type<tc>, window_params = [{transform_indices = @transform_0, window_bounds = array<i64: 8, 32>}, {pipeline_mode = #tpu.pipeline_mode<synchronous>, transform_indices = @transform_1, window_bounds = array<i64: 32, 384>}, {transform_indices = @transform_2, window_bounds = array<i64: 8, 384>}]} {
    %c0 = arith.constant 0 : index
    %c0_0 = arith.constant 0 : index
    %0 = vector.load %arg1[%c0, %c0_0] : memref<8x32xf32, #tpu.memory_space<vmem>>, vector<8x32xf32>
    %c0_1 = arith.constant 0 : index
    %c0_2 = arith.constant 0 : index
    %1 = vector.load %arg2[%c0_1, %c0_2] : memref<32x384xf32, #tpu.memory_space<vmem>>, vector<32x384xf32>
    %cst = arith.constant dense<0.000000e+00> : vector<8x384xf32>
    %2 = tpu.matmul %0, %1, %cst {dimension_numbers = #tpu.dot_dimension_numbers<[1], [0], [0], [1], [0, 0, 1, 1], [], []>} : vector<8x32xf32>, vector<32x384xf32>, vector<8x384xf32> -> vector<8x384xf32>
    %c0_3 = arith.constant 0 : index
    %c0_4 = arith.constant 0 : index
    %3 = vector.load %arg3[%c0_3, %c0_4] : memref<8x384xf32, #tpu.memory_space<vmem>>, vector<8x384xf32>
    tpu.vector_store %arg3[%c0_3, %c0_4], %2 {strides = array<i32>} : memref<8x384xf32, #tpu.memory_space<vmem>>, vector<8x384xf32>,
    return
  }
  func.func @transform_0(%arg0: i32) -> (i32, i32) {
    %c0_i32 = arith.constant 0 : i32
    %c0_i32_0 = arith.constant 0 : i32
    return %arg0, %c0_i32 : i32, i32
  }
  func.func @transform_1(%arg0: i32) -> (i32, i32) {
    %c0_i32 = arith.constant 0 : i32
    %c0_i32_0 = arith.constant 0 : i32
    %c0_i32_1 = arith.constant 0 : i32
    return %c0_i32, %c0_i32_0 : i32, i32
  }
  func.func @transform_2(%arg0: i32) -> (i32, i32) {
    %c0_i32 = arith.constant 0 : i32
    %c0_i32_0 = arith.constant 0 : i32
    return %arg0, %c0_i32 : i32, i32
  }
}

</mosaic_0001>

<bundles_post_ra>
// kernel: tpu_custom_call.1
= control target key start
LH: loop header
LB: loop body
LE: loop exit
PB: predicated region body
PF: predicated region fallthrough
CT: control target
= control target key end

     0   :  { %7 = vsyncpa [#allocation3], 0  ;;  %s393_s0 = inlined_call_operand.hbm [shape: f32[8,32], index: 0, kind: input, shape index: {}]   ;;  %s394_s1 = inlined_call_operand.hbm [shape: f32[32,384], index: 1, kind: input, shape index: {}]   ;;  %s395_s2 = inlined_call_operand.hbm [shape: f32[8,384], index: 2, kind: output, shape index: {}]  }
   0x1   :  { %8 = vsyncpa [#allocation6], 0 }
   0x2   :  { %9 = vsyncpa [#allocation4], 0  ;;  %s327_s9 = smov [#allocation2]   ;;  %s328_s11 = smov [#allocation5]  }
   0x3   :  { %s16_s10 = sshll.u32 %s327_s9, 4  ;;  %s25_s12 = sshll.u32 %s328_s11, 4  ;;  %s17_s10 = int_to_ptr.vmem [resolvable:$true] %s16_s10  ;;  %s350_s12 = int_to_ptr.vmem [resolvable:$true] %s25_s12 }
   0x4   :  { %s255_s15 = scalar_lea.hbm %s393_s0, 128 }
   0x5   :  { %p256_p0 = scmp.ne.s32.totalorder %s393_s0, %s255_s15  ;;  %p259_p1 = scmp.lt.u32.totalorder %s255_s15, %s393_s0 }
   0x7   :  { %p261_p2 = pnand %p259_p1, %p256_p0 }
   0x9   :  { %264 = shalt.err (!%p261_p2)
}
   0xa   :  { %s265_s20 = scalar_lea.vmem %s17_s10, 128  ;;  %p270_p4 = scmp.lt.s32.totalorder %s17_s10, %s17_s10 }
   0xb   :  { %p266_p3 = scmp.ne.s32.totalorder %s17_s10, %s265_s20  ;;  %p271_p5 = scmp.lt.s32.totalorder %s265_s20, %s265_s20 }
   0xd   :  { %p272_p6 = por %p271_p5, %p270_p4 }
   0xf   :  { %p273_p7 = pnand %p272_p6, %p266_p3 }
  0x11   :  { %276 = shalt.err (!%p273_p7)
}
  0x12   :  { %19 = dma.hbm_to_vmem [thread:$0]  %s393_s0, 128, %s17_s10, [#allocation3]  }
  0x13   :  { %s277_s25 = scalar_lea.hbm %s394_s1, 1536 }
  0x14   :  { %p278_p8 = scmp.ne.s32.totalorder %s394_s1, %s277_s25  ;;  %p281_p9 = scmp.lt.u32.totalorder %s277_s25, %s394_s1 }
  0x16   :  { %p283_p10 = pnand %p281_p9, %p278_p8 }
  0x18   :  { %286 = shalt.err (!%p283_p10)
}
  0x19   :  { %s287_s30 = scalar_lea.vmem %s350_s12, 1536  ;;  %p292_p12 = scmp.lt.s32.totalorder %s350_s12, %s350_s12 }
  0x1a   :  { %p288_p11 = scmp.ne.s32.totalorder %s350_s12, %s287_s30  ;;  %p293_p13 = scmp.lt.s32.totalorder %s287_s30, %s287_s30 }
  0x1c   :  { %p294_p0 = por %p293_p13, %p292_p12 }
  0x1e   :  { %p295_p1 = pnand %p294_p0, %p288_p11 }
  0x20   :  { %298 = shalt.err (!%p295_p1)
}
  0x21   :  { %s329_s0 = smov 384   ;;  %s330_s3 = smov 24  }
  0x22   :  { %31 = dma.hbm_to_vmem [thread:$0]  %s394_s1, 1536, %s350_s12, [#allocation6], %s329_s0, %s329_s0, %s330_s3  }
  0x23   :  { %321 = dma.done.wait [#allocation3], 128  }
  0x24   :  { %322 = vsyncadd [#allocation3], 4294967168 }
  0x25   :  { %323 = dma.done.wait [#allocation6], 1536  }
  0x26   :  { %324 = vsyncadd [#allocation6], 4294965760  ;;  %v331_v0 = vmov 0.0|0.0   ;;  %v332_v1 = vmov 0.0   ;;  %vm333_vm0 = vmmov 0   ;;  %v40_v2 = vld [vmem:[#allocation5 + $0x8] sm:$0xff] }
  0x27   :  { %241 = vmatprep.subr.bf16.mxu1 %v331_v0  ;;  %119 = vmatprep.mubr.f32.mxu0 %v332_v1  ;;  %v43_v3 = vld [vmem:[#allocation5 + $0x20] sm:$0xff]  ;;  %v42_v6 = vld [vmem:[#allocation5 + $0x18] sm:$0xff]  ;;  %v41_v7 = vld [vmem:[#allocation5 + $0x10] sm:$0xff]  ;;  %vm51_vm1 = vcmask 261120   ;;  %s334_s1 = smov [#allocation7]  }
  0x28   :  { %230 = vmatprep.mubr.msk.f32.mxu1 %vm333_vm0, %v332_v1  ;;  %v39_v4 = vld [vmem:[#allocation5] sm:$0xff]  ;;  %v233_v5 = vpack.c.bf16 %v43_v3, %v40_v2  ;;  %v44_v8 = vld [vmem:[#allocation5 + $0x28] sm:$0xff]  ;;  %v46_v11 = vld [vmem:[#allocation5 + $0x38] sm:$0xff]  ;;  %s205_s6 = sshll.u32 %s334_s1, 4  ;;  %s206_s6 = int_to_ptr.vmem [resolvable:$true] %s205_s6 }
  0x29   :  { %v235_v9 = vpack.c.bf16 %v42_v6, %v39_v4  ;;  %v242_v10 = vpack.c.bf16 %v44_v8, %v41_v7  ;;  %v49_v12 = vld [vmem:[#allocation5 + $0x50] sm:$0xff]  ;;  %v48_v15 = vld [vmem:[#allocation5 + $0x48] sm:$0xff]  ;;  %v47_v16 = vld [vmem:[#allocation5 + $0x40] sm:$0xff]  ;;  %s299_s7 = scalar_lea.vmem %s206_s6, 384  ;;  %p304_p3 = scmp.lt.s32.totalorder %s206_s6, %s206_s6 }
  0x2a   :  { %v45_v13 = vld [vmem:[#allocation5 + $0x30] sm:$0xff]  ;;  %234 = vmatprep.subr.bf16.mxu0 %v233_v5  ;;  %v237_v14 = vpack.c.bf16 %v49_v12, %v46_v11  ;;  %v50_v17 = vld [vmem:[#allocation5 + $0x58] sm:$0xff]  ;;  %p300_p2 = scmp.ne.s32.totalorder %s206_s6, %s299_s7  ;;  %p305_p4 = scmp.lt.s32.totalorder %s299_s7, %s299_s7 }
  0x2b   :  { %236 = vmatpush1.bf16.msra.mxu0 %v235_v9  ;;  %243 = vmatpush3.bf16.msra.mxu1 %v242_v10  ;;  %v239_v18 = vpack.c.bf16 %v48_v15, %v45_v13  ;;  %v245_v19 = vpack.c.bf16 %v50_v17, %v47_v16  ;;  %v38_v20 = vld [vmem:[#allocation2] sm:$0xff] }
  0x2c   :  { %238 = vmatprep.subr.bf16.mxu0 %v237_v14  ;;  %244 = vmatprep.subr.bf16.mxu1 %v331_v0  ;;  %p306_p5 = por %p305_p4, %p304_p3 }
  0x2e   :  { %p307_p6 = pnand %p306_p5, %p300_p2 }
  0x2f   :  { %240 = vmatpush1.bf16.msra.mxu0 %v239_v18  ;;  %246 = vmatpush3.bf16.msra.mxu1 %v245_v19 }
  0x32   :  { %215 = vmatmul.mubr.msk.f32.vlgmr.msra.gmra.mrb[0].mxu0 %vm51_vm1, %v38_v20  ;;  %231 = vmatmul.mubr.msk.f32.vlgmr.msra.gmra.mrb[0].mxu1 %vm51_vm1, %v38_v20 }
 0x105   :  { %v121_v21 = vpop.f32.mrb[0].mxu0  ;;  %v192_v22 = vpop.f32.mrb[0].mxu1 }
 0x106   :  { %196 = vst [vmem:[#allocation7] sm:$0xff] %v121_v21  ;;  %198 = vst [vmem:[#allocation7 + $0x10] sm:$0xff] %v192_v22  ;;  %v123_v23 = vpop.f32.mrb[1].mxu0  ;;  %v232_v24 = vpop.f32.mrb[1].mxu1 }
 0x107   :  { %197 = vst [vmem:[#allocation7 + $0x8] sm:$0xff] %v123_v23 }
 0x108   :  { %310 = shalt.err (!%p307_p6)
}
 0x109   :  { %s311_s10 = scalar_lea.hbm %s395_s2, 384 }
 0x10a   :  { %p312_p7 = scmp.ne.s32.totalorder %s395_s2, %s311_s10  ;;  %p315_p8 = scmp.lt.u32.totalorder %s311_s10, %s395_s2 }
 0x10c   :  { %p317_p9 = pnand %p315_p8, %p312_p7 }
 0x10e   :  { %320 = shalt.err (!%p317_p9)
}
 0x10f   :  { %208 = dma.vmem_to_hbm [thread:$0]  %s206_s6, 384, %s395_s2, [#allocation4]  }
 0x110   :  { %325 = dma.done.wait [#allocation4], 384  }
 0x111   :  { %326 = vsyncadd [#allocation4], 4294966912 }
 0x112   :  { %212 = vsyncpa [#allocation3], 1 }
 0x113   :  { %213 = vsyncpa [#allocation6], 1 }
 0x114   :  { %214 = vsyncpa [#allocation4], 1 }

</bundles_post_ra>
